<compile_context>
chip_gen: v7x
topology: tpu7x:2x2x1
jax: 0.10.0
libtpu: 0.0.40
codegen_flags: <defaults>
</compile_context>

<pallas_src>
import jax
import jax.numpy as jnp
import numpy as np
from jax.experimental import pallas as pl
from jax.experimental.pallas import tpu as pltpu

_EPS = 1e-30  # guards log(0); perturbs |tanh| values by < 1e-30 (documented)


def dgl_graph_conv(adj, feat, w_sum, w_prod, v, w_att1, w_att2, w_attvec,
                   *, tm=256, tk=512, tp=256):
    """Forward pass of DGLGraphConv on a dense 0/1 adjacency (adj[dst, src])."""
    N, in_feats = feat.shape
    out_feats = w_sum.shape[1]
    rank = v.shape[0]
    packed_w = out_feats + 2 * rank  # [h_sum | log|h_prod| | neg_indicator]

    tm = min(tm, N)
    tk = min(tk, N)
    tp = min(tp, N)
    if N % tm != 0 or N % tk != 0 or N % tp != 0:
        raise ValueError(f"N={N} must be divisible by tile sizes ({tm},{tk},{tp})")
    # OUT and R should be multiples of 128 for lane-dense layout (true here).

    # Split the (IN+1, R) parameter into an aligned weight and a bias row so no
    # odd-row slice happens inside a kernel.
    wp_w = w_prod[:-1, :]            # [IN, R]
    wp_b = w_prod[-1:, :]            # [1, R]
    wv_flat = w_attvec.reshape(-1)   # [4] -> SMEM scalars

    # adj is 0/1 -> exact in bf16; halves adj HBM/VMEM traffic and enables a
    # native bf16 MXU matmul in the aggregation kernel.
    adj_bf16 = adj.astype(jnp.bfloat16)

    # ------------------------------------------------------------------
    # Prologue: per-node transforms, computed ONCE over all N source rows and
    # packed into a single bf16 [N, OUT + 2R] array (hoisted out of the main
    # (dst, src) loop -- this was the biggest redundant HBM/MXU stream before).
    # ------------------------------------------------------------------
    def transform_kernel(feat_ref, w_sum_ref, wp_w_ref, wp_b_ref, packed_ref):
        feat_blk = feat_ref[...]                                   # [tp, IN] f32
        h_sum = jnp.dot(feat_blk, w_sum_ref[...],
                        preferred_element_type=jnp.float32)        # [tp, OUT]
        h_prod = jnp.tanh(
            jnp.dot(feat_blk, wp_w_ref[...],
                    preferred_element_type=jnp.float32) + wp_b_ref[...])  # [tp, R]
        log_abs = jnp.log(jnp.abs(h_prod) + _EPS)                  # [tp, R]
        neg_ind = (h_prod < 0.0).astype(jnp.float32)               # [tp, R], 0/1
        packed = jnp.concatenate([h_sum, log_abs, neg_ind], axis=-1)
        packed_ref[...] = packed.astype(packed_ref.dtype)

    packed = pl.pallas_call(
        transform_kernel,
        out_shape=jax.ShapeDtypeStruct((N, packed_w), jnp.bfloat16),
        grid=(N // tp,),
        in_specs=[
            pl.BlockSpec((tp, in_feats), lambda i: (i, 0)),        # feat rows
            pl.BlockSpec((in_feats, out_feats), lambda i: (0, 0)),  # w_sum
            pl.BlockSpec((in_feats, rank), lambda i: (0, 0)),       # wp_w
            pl.BlockSpec((1, rank), lambda i: (0, 0)),              # wp_b
        ],
        out_specs=pl.BlockSpec((tp, packed_w), lambda i: (i, 0)),
        compiler_params=pltpu.CompilerParams(
            dimension_semantics=("parallel",),
        ),
    )(feat, w_sum, wp_w, wp_b)

    # ------------------------------------------------------------------
    # Main kernel: one wide bf16 aggregation matmul per (dst, src) tile with a
    # single resident f32 accumulator; epilogue fused into the last K step.
    # ------------------------------------------------------------------
    def aggregate_kernel(adj_ref, packed_ref, v_ref, wa1_ref, wa2_ref, wv_ref,
                         out_ref, acc_ref):
        # adj_ref:    [tm, tk]        bf16 (0/1 exact)
        # packed_ref: [tk, OUT+2R]    bf16  [h_sum | log|h| | neg]
        # v_ref:      [R, OUT] f32    wa1/wa2: [1, OUT] f32
        # wv_ref:     [4] f32 SMEM    flattened att_vec weight
        # out_ref:    [tm, OUT] f32   resident across K, written at last k
        # acc_ref:    [tm, OUT+2R]    f32 VMEM accumulator
        k = pl.program_id(1)

        @pl.when(k == 0)
        def _init():
            acc_ref[...] = jnp.zeros_like(acc_ref)

        # Single fused bf16 x bf16 -> f32 MXU matmul (sum + log-prod + neg cnt).
        acc_ref[...] += jnp.dot(adj_ref[...], packed_ref[...],
                                preferred_element_type=jnp.float32)

        @pl.when(k == pl.num_programs(1) - 1)
        def _finalize():
            acc = acc_ref[...]                                  # [tm, OUT+2R]
            sum_agg = acc[:, :out_feats]                        # [tm, OUT]
            log_sum = acc[:, out_feats:out_feats + rank]        # [tm, R]
            neg_cnt = acc[:, out_feats + rank:]                 # [tm, R] ints in f32

            # Sign of the product: parity of the negative-factor count
            # (exact small integers in f32 -> integer AND on the VPU).
            parity = (neg_cnt.astype(jnp.int32) & 1).astype(jnp.float32)
            sign = 1.0 - 2.0 * parity
            prod_dst = sign * jnp.exp(log_sum)                  # [tm, R]
            prod_agg = jnp.dot(prod_dst, v_ref[...],
                               preferred_element_type=jnp.float32)  # [tm, OUT]

            # att1 / att2: Linear(out_feats, 1, bias=False).
            a1 = jnp.sum(prod_agg * wa1_ref[...], axis=-1, keepdims=True)
            a2 = jnp.sum(sum_agg * wa2_ref[...], axis=-1, keepdims=True)
            s1 = jax.nn.sigmoid(a1)
            s2 = jax.nn.sigmoid(a2)

            # att_vec (2x2, no bias), /T with T=2, softmax over the 2 columns.
            # softmax([y1,y2]) == [sigmoid(y1-y2), 1-sigmoid(y1-y2)] (exact).
            w00, w01, w10, w11 = wv_ref[0], wv_ref[1], wv_ref[2], wv_ref[3]
            y1 = (s1 * w00 + s2 * w01) * 0.5
            y2 = (s1 * w10 + s2 * w11) * 0.5
            att_prod = jax.nn.sigmoid(y1 - y2)
            att_sum = 1.0 - att_prod

            out_ref[...] = att_prod * prod_agg + att_sum * sum_agg

    grid = (N // tm, N // tk)  # (dst tiles: parallel, src/K tiles: arbitrary)

    return pl.pallas_call(
        aggregate_kernel,
        out_shape=jax.ShapeDtypeStruct((N, out_feats), jnp.float32),
        grid=grid,
        in_specs=[
            # adj tile; if the adj DMA shows exposed on v6e, add
            # pipeline_mode=pl.Buffered(3) here for deeper buffering.
            pl.BlockSpec((tm, tk), lambda i, k: (i, k)),
            pl.BlockSpec((tk, packed_w), lambda i, k: (k, 0)),    # packed RHS
            pl.BlockSpec((rank, out_feats), lambda i, k: (0, 0)),  # v
            pl.BlockSpec((1, out_feats), lambda i, k: (0, 0)),     # w_att1
            pl.BlockSpec((1, out_feats), lambda i, k: (0, 0)),     # w_att2
            pl.BlockSpec(memory_space=pltpu.MemorySpace.SMEM),     # att_vec (4,)
        ],
        out_specs=pl.BlockSpec((tm, out_feats), lambda i, k: (i, 0)),
        scratch_shapes=[
            pltpu.VMEM((tm, packed_w), jnp.float32),   # single fused accumulator
        ],
        compiler_params=pltpu.CompilerParams(
            dimension_semantics=("parallel", "arbitrary"),
            # Headroom for larger tile sweeps; stays under v7x's 64 MiB per-TC
            # VMEM.  On v5e/v6e (128 MiB) this can be raised further if tiles
            # are grown well beyond the defaults.
            vmem_limit_bytes=56 * 1024 * 1024,
        ),
    )(adj_bf16, packed, v, w_att1, w_att2, wv_flat)


def reference(adj, feat, w_sum, w_prod, v, w_att1, w_att2, w_attvec, chunk=64):
    """float64 numpy reference mirroring the PyTorch forward semantics."""
    adj = np.asarray(adj, np.float64)
    feat = np.asarray(feat, np.float64)
    w_sum = np.asarray(w_sum, np.float64)
    w_prod = np.asarray(w_prod, np.float64)
    v = np.asarray(v, np.float64)
    w_att1 = np.asarray(w_att1, np.float64)
    w_att2 = np.asarray(w_att2, np.float64)
    w_attvec = np.asarray(w_attvec, np.float64)

    h_sum = feat @ w_sum
    ones = np.ones((feat.shape[0], 1), np.float64)
    h_prod = np.tanh(np.concatenate([feat, ones], axis=1) @ w_prod)
    sum_agg = adj @ h_sum

    # DGL prod reducer: product of h_prod over incoming neighbors (chunked over
    # destination nodes to bound host memory).
    N = adj.shape[0]
    prod_dst = np.empty((N, h_prod.shape[1]), np.float64)
    for s in range(0, N, chunk):
        a = adj[s:s + chunk]                                    # [c, N]
        masked = np.where(a[:, :, None] > 0, h_prod[None, :, :], 1.0)
        prod_dst[s:s + chunk] = np.prod(masked, axis=1)

    prod_agg = prod_dst @ v
    a1 = prod_agg @ w_att1.T
    a2 = sum_agg @ w_att2.T
    sig = 1.0 / (1.0 + np.exp(-np.concatenate([a1, a2], axis=1)))
    logits = (sig @ w_attvec.T) / 2.0
    logits = logits - logits.max(axis=1, keepdims=True)
    e = np.exp(logits)
    att = e / e.sum(axis=1, keepdims=True)
    return att[:, 0:1] * prod_agg + att[:, 1:2] * sum_agg


def xavier_uniform(key, shape):
    fan_in, fan_out = shape[0], shape[1]
    bound = float(np.sqrt(6.0 / (fan_in + fan_out)))
    return jax.random.uniform(key, shape, jnp.float32, -bound, bound)


if __name__ == "__main__":
    # Lane-dense problem sizes (multiples of 128 / full-lane last dims).
    # N=512 with tm=tk=256 -> grid (2, 2): two parallel dst tiles (v7x gets
    # both TensorCores busy) and two K tiles (exercises accumulation).
    N, IN_FEATS, OUT_FEATS, RANK = 512, 128, 128, 128

    key = jax.random.PRNGKey(0)
    k_feat, k_adj, k_ws, k_wp, k_v, k_a1, k_a2, k_av = jax.random.split(key, 8)

    # Node features.
    feat = jax.random.normal(k_feat, (N, IN_FEATS), jnp.float32)

    # Sparse-ish random adjacency (dst, src) with self-loops so every node has
    # in-degree >= 1 (the module forbids zero-in-degree nodes).
    adj = (jax.random.uniform(k_adj, (N, N)) < 0.03).astype(jnp.float32)
    adj = jnp.maximum(adj, jnp.eye(N, dtype=jnp.float32))

    # Parameters (deterministic xavier-uniform; shapes from DGLGraphConv).
    w_sum = xavier_uniform(k_ws, (IN_FEATS, OUT_FEATS))
    w_prod = xavier_uniform(k_wp, (IN_FEATS + 1, RANK))
    v = xavier_uniform(k_v, (RANK, OUT_FEATS))
    w_att1 = xavier_uniform(k_a1, (1, OUT_FEATS))   # att1 = Linear(out_feats, 1)
    w_att2 = xavier_uniform(k_a2, (1, OUT_FEATS))   # att2 = Linear(out_feats, 1)
    w_attvec = xavier_uniform(k_av, (2, 2))         # att_vec = Linear(2, 2)

    out = dgl_graph_conv(adj, feat, w_sum, w_prod, v, w_att1, w_att2, w_attvec,
                         tm=256, tk=256)
    out = jax.block_until_ready(out)

    ref = reference(adj, feat, w_sum, w_prod, v, w_att1, w_att2, w_attvec)
    # Tolerance budget: the packed activations (h_sum, log|h_prod|) are rounded
    # to bf16 (~2^-9 half-ulp relative) before the MXU aggregation; summed over
    # the ~16 in-neighbors this gives ~1e-2 absolute error on sum_agg-scale
    # values (plus the f32 log/exp round-trip on the product path, which is
    # negligible here).  3e-2 rtol/atol covers this with ~2x headroom.
    np.testing.assert_allclose(np.asarray(out), ref, rtol=3e-2, atol=3e-2)
    print("KERNEL_OK")
</pallas_src>

<mosaic_0001>
module attributes {stable_mosaic.version = 11 : i64} {
  func.func @transform_kernel(%arg0: i32, %arg1: memref<256x128xf32, #tpu.memory_space<vmem>>, %arg2: memref<128x128xf32, #tpu.memory_space<vmem>>, %arg3: memref<128x128xf32, #tpu.memory_space<vmem>>, %arg4: memref<1x128xf32, #tpu.memory_space<vmem>>, %arg5: memref<256x384xbf16, #tpu.memory_space<vmem>>) attributes {dimension_semantics = [#tpu.dimension_semantics<parallel>], iteration_bounds = array<i64: 2>, scalar_prefetch = 0 : i64, scratch_operands = 0 : i64, tpu.core_type = #tpu.core_type<tc>, window_params = [{transform_indices = @transform_0, window_bounds = array<i64: 256, 128>}, {pipeline_mode = #tpu.pipeline_mode<synchronous>, transform_indices = @transform_1, window_bounds = array<i64: 128, 128>}, {pipeline_mode = #tpu.pipeline_mode<synchronous>, transform_indices = @transform_2, window_bounds = array<i64: 128, 128>}, {pipeline_mode = #tpu.pipeline_mode<synchronous>, transform_indices = @transform_3, window_bounds = array<i64: 1, 128>}, {transform_indices = @transform_4, window_bounds = array<i64: 256, 384>}]} {
    %c0 = arith.constant 0 : index
    %c0_0 = arith.constant 0 : index
    %0 = vector.load %arg1[%c0, %c0_0] : memref<256x128xf32, #tpu.memory_space<vmem>>, vector<256x128xf32>
    %c0_1 = arith.constant 0 : index
    %c0_2 = arith.constant 0 : index
    %1 = vector.load %arg2[%c0_1, %c0_2] : memref<128x128xf32, #tpu.memory_space<vmem>>, vector<128x128xf32>
    %cst = arith.constant dense<0.000000e+00> : vector<256x128xf32>
    %2 = tpu.matmul %0, %1, %cst {dimension_numbers = #tpu.dot_dimension_numbers<[1], [0], [0], [1], [0, 0, 1, 1], [], []>} : vector<256x128xf32>, vector<128x128xf32>, vector<256x128xf32> -> vector<256x128xf32>
    %c0_3 = arith.constant 0 : index
    %c0_4 = arith.constant 0 : index
    %3 = vector.load %arg3[%c0_3, %c0_4] : memref<128x128xf32, #tpu.memory_space<vmem>>, vector<128x128xf32>
    %cst_5 = arith.constant dense<0.000000e+00> : vector<256x128xf32>
    %4 = tpu.matmul %0, %3, %cst_5 {dimension_numbers = #tpu.dot_dimension_numbers<[1], [0], [0], [1], [0, 0, 1, 1], [], []>} : vector<256x128xf32>, vector<128x128xf32>, vector<256x128xf32> -> vector<256x128xf32>
    %c0_6 = arith.constant 0 : index
    %c0_7 = arith.constant 0 : index
    %5 = vector.load %arg4[%c0_6, %c0_7] : memref<1x128xf32, #tpu.memory_space<vmem>>, vector<1x128xf32>
    %6 = vector.broadcast %5 : vector<1x128xf32> to vector<256x128xf32>
    %7 = arith.addf %4, %6 : vector<256x128xf32>
    %8 = math.tanh %7 : vector<256x128xf32>
    %9 = math.absf %8 : vector<256x128xf32>
    %cst_8 = arith.constant 1.000000e-30 : f32
    %10 = vector.broadcast %cst_8 : f32 to vector<256x128xf32>
    %11 = arith.addf %9, %10 : vector<256x128xf32>
    %12 = math.log %11 : vector<256x128xf32>
    %cst_9 = arith.constant 0.000000e+00 : f32
    %13 = vector.broadcast %cst_9 : f32 to vector<256x128xf32>
    %14 = arith.cmpf olt, %8, %13 : vector<256x128xf32>
    %15 = arith.extui %14 : vector<256x128xi1> to vector<256x128xi32>
    %16 = arith.sitofp %15 : vector<256x128xi32> to vector<256x128xf32>
    %17 = tpu.concatenate %2, %12, %16 in 1 : vector<256x128xf32>, vector<256x128xf32>, vector<256x128xf32> -> vector<256x384xf32>
    %18 = arith.truncf %17 : vector<256x384xf32> to vector<256x384xbf16>
    %c0_10 = arith.constant 0 : index
    %c0_11 = arith.constant 0 : index
    %19 = vector.load %arg5[%c0_10, %c0_11] : memref<256x384xbf16, #tpu.memory_space<vmem>>, vector<256x384xbf16>
    tpu.vector_store %arg5[%c0_10, %c0_11], %18 {strides = array<i32>} : memref<256x384xbf16, #tpu.memory_space<vmem>>, vector<256x384xbf16>,
    return
  }
  func.func @transform_0(%arg0: i32) -> (i32, i32) {
    %c0_i32 = arith.constant 0 : i32
    %c0_i32_0 = arith.constant 0 : i32
    return %arg0, %c0_i32 : i32, i32
  }
  func.func @transform_1(%arg0: i32) -> (i32, i32) {
    %c0_i32 = arith.constant 0 : i32
    %c0_i32_0 = arith.constant 0 : i32
    %c0_i32_1 = arith.constant 0 : i32
    return %c0_i32, %c0_i32_0 : i32, i32
  }
  func.func @transform_2(%arg0: i32) -> (i32, i32) {
    %c0_i32 = arith.constant 0 : i32
    %c0_i32_0 = arith.constant 0 : i32
    %c0_i32_1 = arith.constant 0 : i32
    return %c0_i32, %c0_i32_0 : i32, i32
  }
  func.func @transform_3(%arg0: i32) -> (i32, i32) {
    %c0_i32 = arith.constant 0 : i32
    %c0_i32_0 = arith.constant 0 : i32
    %c0_i32_1 = arith.constant 0 : i32
    return %c0_i32, %c0_i32_0 : i32, i32
  }
  func.func @transform_4(%arg0: i32) -> (i32, i32) {
    %c0_i32 = arith.constant 0 : i32
    %c0_i32_0 = arith.constant 0 : i32
    return %arg0, %c0_i32 : i32, i32
  }
}

</mosaic_0001>

<bundles_post_ra>
// kernel: tpu_custom_call.1
= control target key start
LH: loop header
LB: loop body
LE: loop exit
PB: predicated region body
PF: predicated region fallthrough
CT: control target
= control target key end

     0   :  { %9 = vsyncpa [#allocation3], 0  ;;  %s3002_s0 = inlined_call_operand.hbm [shape: f32[512,128], index: 0, kind: input, shape index: {}]   ;;  %s3003_s1 = inlined_call_operand.hbm [shape: f32[128,128], index: 1, kind: input, shape index: {}]   ;;  %s3004_s2 = inlined_call_operand.hbm [shape: f32[128,128], index: 2, kind: input, shape index: {}]   ;;  %s3005_s3 = inlined_call_operand.vmem [shape: f32[1,128], index: 3, kind: input, shape index: {}]   ;;  %s3006_s4 = inlined_call_operand.hbm [shape: bf16[512,384], index: 4, kind: output, shape index: {}]  }
   0x1   :  { %11 = vsyncpa [#allocation3 + $0x1], 0 }
   0x2   :  { %12 = vsyncpa [#allocation6], 0 }
   0x3   :  { %13 = vsyncpa [#allocation4], 0 }
   0x4   :  { %15 = vsyncpa [#allocation4 + $0x1], 0  ;;  %s2408_s15 = smov 0   ;;  %s2410_s16 = smov 0  }
   0x5   :  { %s2412_s17 = smov 0   ;;  %s2414_s18 = smov 0  }
   0x6 LB: > { %s2429_s19 = sadd.s32 4294967295, %s2372_s18   ;;  %s1515_s20 = sadd.s32 4294967294, %s2372_s18   ;;  %s2372_s18 = sphi %s2414_s18, %s3026_s18   ;;  %s2368_s17 = sphi %s2412_s17, %s3025_s17   ;;  %s2364_s16 = sphi %s2410_s16, %s3024_s16   ;;  %s2360_s15 = sphi %s2408_s15, %s3023_s15  }
   0x7   : > { %p41_p0 = scmp.ne.s32.totalorder %s2364_s16, %s2360_s15  ;;  %p3007_p1 = scmp.eq.s32.totalorder %s2429_s19, 0 }
   0x8   : > { %p134_p3 = scmp.eq.s32.totalorder %s1515_s20, 1  ;;  %p1516_p5 = scmp.ge.s32.totalorder %s2372_s18, 1 }
   0x9   : > { %p2438_p4 = por %p3007_p1, %p41_p0  ;;  %p141_p7 = scmp.lt.s32.totalorder %s2372_s18, 3 }
   0xa   : > { %p2443_p6 = por %p134_p3, %p41_p0  ;;  %s2374_s24 = smov [#allocation5]  }
   0xb   : > { %s3010_s21 = scalar_select %p2438_p4, 1, 0 }
   0xc   : > { %s3011_s22 = scalar_select %p2443_p6, 1, 0 }
   0xd   : > { %p2448_p8 = pnand %p1516_p5, %p141_p7  ;;  %s153_s25 = sshll.u32 %s2374_s24, 4  ;;  %s2452_s25 = int_to_ptr.vmem [resolvable:$true] %s153_s25 }
   0xe   : > { %s2375_s27 = smov [#allocation7]   ;;  %s2216_s5 = scalar_lea.hbm %s3003_s1, 2048 }
   0xf   : > { %p2028_p9 = pneg %p2448_p8  ;;  %s166_s28 = sshll.u32 %s2375_s27, 4  ;;  %s2463_s28 = int_to_ptr.vmem [resolvable:$true] %s166_s28 }
  0x10   : > { %p2217_p12 = scmp.ne.s32.totalorder %s3003_s1, %s2216_s5  ;;  %p2223_p5 = scmp.lt.u32.totalorder %s2216_s5, %s3003_s1 }
  0x11   : > { %p2459_p11 = pnand %p2028_p9, %p3007_p1 }
  0x13   : > { %p2218_p13 = pneg %p2459_p11 }
  0x15   : > { %p2219_p0 = pnand %p2218_p13, %p2217_p12 }
  0x17   : > { %p2220_p3 = pneg %p2219_p0 }
  0x19   : > { %p2225_p7 = pnand %p2223_p5, %p2220_p3 }
  0x1b   : > { %2228 = shalt.err (!%p2225_p7)
}
  0x1c   : > { %s2229_s10 = scalar_lea.vmem %s2452_s25, 2048  ;;  %p2237_p2 = scmp.lt.s32.totalorder %s2452_s25, %s2452_s25 }
  0x1d   : > { %p2230_p9 = scmp.ne.s32.totalorder %s2452_s25, %s2229_s10  ;;  %p2238_p12 = scmp.lt.s32.totalorder %s2229_s10, %s2229_s10 }
  0x1f   : > { %p2232_p10 = pnand %p2230_p9, %p2218_p13  ;;  %p2239_p0 = por %p2238_p12, %p2237_p2 }
  0x21   : > { %p2233_p1 = pneg %p2232_p10 }
  0x23   : > { %p2240_p6 = pnand %p2239_p0, %p2233_p1 }
  0x25   : > { %2243 = shalt.err (!%p2240_p6)
}
  0x26   : > { %s2376_s11 = smov 128   ;;  %s2377_s12 = smov 8  }
  0x27   : > { %2031 = dma.hbm_to_vmem [thread:$0]  (!%p2459_p11), %s3003_s1, 2048, %s2452_s25, [#allocation6], %s2376_s11, %s2376_s11, %s2377_s12  }
  0x28   : > { %s2244_s27 = scalar_lea.hbm %s3004_s2, 2048 }
  0x29   : > { %p2245_p1 = scmp.ne.s32.totalorder %s3004_s2, %s2244_s27  ;;  %p2251_p10 = scmp.lt.u32.totalorder %s2244_s27, %s3004_s2 }
  0x2b   : > { %p2247_p2 = pnand %p2245_p1, %p2218_p13 }
  0x2d   : > { %p2248_p6 = pneg %p2247_p2 }
  0x2f   : > { %p2253_p3 = pnand %p2251_p10, %p2248_p6 }
  0x31   : > { %2256 = shalt.err (!%p2253_p3)
}
  0x32   : > { %s2257_s25 = scalar_lea.vmem %s2463_s28, 2048  ;;  %p2265_p12 = scmp.lt.s32.totalorder %s2463_s28, %s2463_s28 }
  0x33   : > { %p2258_p5 = scmp.ne.s32.totalorder %s2463_s28, %s2257_s25  ;;  %p2266_p0 = scmp.lt.s32.totalorder %s2257_s25, %s2257_s25 }
  0x35   : > { %p2260_p7 = pnand %p2258_p5, %p2218_p13  ;;  %p2267_p1 = por %p2266_p0, %p2265_p12 }
  0x37   : > { %p2261_p9 = pneg %p2260_p7 }
  0x39   : > { %p2268_p2 = pnand %p2267_p1, %p2261_p9 }
  0x3b   : > { %2271 = shalt.err (!%p2268_p2)
}
  0x3c   : > { %2034 = dma.hbm_to_vmem [thread:$0]  (!%p2459_p11), %s3004_s2, 2048, %s2463_s28, [#allocation6], %s2376_s11, %s2376_s11, %s2377_s12  }
  0x3d   : > { %s2524_s26 = sadd.s32 1, %s2372_s18   ;;  %s28_s9 = sadd.s32 1, %s2368_s17 }
  0x3e   : > { %s25_s10 = ssub.s32 %s2372_s18, %s2524_s26  ;;  %p35_p13 = scmp.ne.s32.totalorder %s2368_s17, %s2364_s16 }
  0x3f   : > { %p26_p6 = scmp.eq.s32.totalorder %s25_s10, 0  ;;  %p36_p10 = scmp.eq.s32.totalorder %s2372_s18, 0 }
  0x40   : > { %p3014_p3 = scmp.eq.s32.totalorder %s2429_s19, 1  ;;  %p2045_p7 = scmp.lt.s32.totalorder %s2372_s18, 2 }
  0x41   : > { %s2540_s14 = scalar_select %p26_p6, %s2368_s17, %s28_s9  }
  0x42   : > { %p2534_p5 = por %p3014_p3, %p35_p13  ;;  %p37_p9 = por %p36_p10, %p35_p13 }
  0x43   : > { %s183_s20 = sand.u32 1, %s2368_s17   ;;  %s1629_s28 = sshll.u32 %s2372_s18, 12 }
  0x44   : > { %s3015_s13 = scalar_select %p2534_p5, 1, 0 }
  0x45   : > { %s1520_s24 = sshll.u32 %s183_s20, 8  ;;  %s2547_s30 = scalar_lea.hbm %s3002_s0, %s1629_s28 }
  0x46   : > { %s187_s5 = scalar_lea.vmem [#allocation2], %s1520_s24  ;;  %p2551_p11 = pnand %p2045_p7, %p37_p9 }
  0x47   : > { %s194_s6 = sshll.u32 %s187_s5, 4  ;;  %s2555_s7 = scalar_lea.sflag [#allocation3], %s183_s20  ;;  %s2549_s6 = int_to_ptr.vmem [resolvable:$true] %s194_s6 }
  0x48   : > { %s2272_s8 = scalar_lea.hbm %s2547_s30, 4096  ;;  %p2274_p0 = pneg %p2551_p11 }
  0x49   : > { %p2273_p12 = scmp.ne.s32.totalorder %s2547_s30, %s2272_s8  ;;  %s2277_s24 = scalar_lea.hbm %s3002_s0, 8192 }
  0x4a   : > { %p2278_p13 = scmp.lt.u32.totalorder %s2547_s30, %s3002_s0  ;;  %p2279_p6 = scmp.lt.u32.totalorder %s2277_s24, %s2272_s8 }
  0x4b   : > { %p2275_p1 = pnand %p2274_p0, %p2273_p12  ;;  %p2281_p3 = scmp.lt.u32.totalorder %s2272_s8, %s2547_s30 }
  0x4c   : > { %p2280_p10 = por %p2279_p6, %p2278_p13 }
  0x4d   : > { %p2276_p2 = pneg %p2275_p1 }
  0x4e   : > { %p2282_p7 = por %p2281_p3, %p2280_p10 }
  0x50   : > { %p2283_p9 = pnand %p2282_p7, %p2276_p2 }
  0x52   : > { %2286 = shalt.err (!%p2283_p9)
}
  0x53   : > { %s2287_s20 = scalar_lea.vmem %s2549_s6, 4096  ;;  %s2378_s29 = smov [#allocation2]  }
  0x54   : > { %p2288_p12 = scmp.ne.s32.totalorder %s2549_s6, %s2287_s20  ;;  %s2292_s5 = sshll.u32 %s2378_s29, 4  ;;  %s2293_s5 = int_to_ptr.vmem [resolvable:$false] %s2292_s5 }
  0x55   : > { %s2294_s9 = scalar_lea.vmem %s2293_s5, 8192  ;;  %p2295_p4 = scmp.lt.s32.totalorder %s2549_s6, %s2293_s5 }
  0x56   : > { %p2290_p1 = pnand %p2288_p12, %p2274_p0  ;;  %p2296_p13 = scmp.lt.s32.totalorder %s2294_s9, %s2287_s20 }
  0x58   : > { %p2291_p5 = pneg %p2290_p1  ;;  %p2297_p6 = por %p2296_p13, %p2295_p4 }
  0x5a   : > { %p2298_p10 = pnand %p2297_p6, %p2291_p5 }
  0x5c   : > { %2301 = shalt.err (!%p2298_p10)
}
  0x5d   : > { %2038 = dma.hbm_to_vmem [thread:$0]  (!%p2551_p11), %s2547_s30, 4096, %s2549_s6, %s2555_s7, %s2376_s11, %s2376_s11, %s2377_s12  }
  0x5e   : > { %206 = sbr.rel (%p2448_p8) target bundleno = 470 (0x1d6), region = 36  ;;  %s2589_s8 = sand.u32 (!%p2448_p8), 1, %s2364_s16  }
  0x5f   : > { %s1524_s10 = sshll.u32 (!%p2448_p8), %s2589_s8, 8  ;;  %s209_s24 = scalar_lea.sflag (!%p2448_p8), [#allocation3], %s2589_s8 }
  0x60   : > { %s2593_s28 = scalar_lea.vmem (!%p2448_p8), [#allocation2], %s1524_s10  ;;  %p3017_p4 = scmp.ne.s32.totalorder (!%p2448_p8), %s3010_s21, 0 }
  0x65   : > { %2347 = dma.done.wait (%p3017_p4), %s209_s24, 4096  }
  0x66   : > { %2349 = vsyncadd (%p3017_p4), %s209_s24, 4294963200  ;;  %p3018_p5 = scmp.eq.s32.totalorder %s2429_s19, 0 }
  0x68   : > { %2351 = dma.done.wait (%p3018_p5), [#allocation6], 4096   ;;  %p3019_p8 = pmov %p3018_p5 }
  0x69   : > { %v520_v0 = vld [vmem:[#allocation7] sm:$0xff]  ;;  %v521_v1 = vld [vmem:[#allocation7 + $0x8] sm:$0xff]  ;;  %v522_v2 = vld [vmem:[#allocation7 + $0x10] sm:$0xff]  ;;  %s2014_s11 = smul.u32 384, %s2589_s8  ;;  %s1409_s27 = scalar_lea.sflag [#allocation4], %s2589_s8 }
  0x6a   : > { %2353 = vsyncadd (%p3019_p8), [#allocation6], 4294963200  ;;  %v1982_v3 = vpack.c.bf16 %v521_v1, %v520_v0  ;;  %v523_v4 = vld [vmem:[#allocation7 + $0x18] sm:$0xff]  ;;  %v524_v6 = vld [vmem:[#allocation7 + $0x20] sm:$0xff]  ;;  %s2015_s30 = smul.u32 6144, %s2429_s19  ;;  %p3020_p0 = scmp.ne.s32.totalorder %s3015_s13, 0 }
  0x6b   : > { %v1986_v5 = vpack.c.bf16 %v523_v4, %v522_v2  ;;  %v525_v7 = vld [vmem:[#allocation7 + $0x28] sm:$0xff]  ;;  %v526_v9 = vld [vmem:[#allocation7 + $0x30] sm:$0xff]  ;;  %v279_v10 = vld [vmem:[#allocation5] sm:$0xff]  ;;  %s2666_s12 = scalar_lea.vmem [#allocation8], %s2014_s11  ;;  %s2380_s29 = smov [#allocation8]  }
  0x6c   : > { %1983 = vmatprep.subr.bf16.mxu1 %v1982_v3  ;;  %v1990_v8 = vpack.c.bf16 %v525_v7, %v524_v6  ;;  %v280_v11 = vld [vmem:[#allocation5 + $0x8] sm:$0xff]  ;;  %v527_v12 = vld [vmem:[#allocation7 + $0x38] sm:$0xff]  ;;  %v247_v14 = vld [vmem:[%s2593_s28] sm:$0xff]  ;;  %s1423_s6 = sshll.u32 %s2666_s12, 4  ;;  %s2952_s7 = scalar_lea.hbm %s3006_s4, %s2015_s30  ;;  %s2956_s6 = int_to_ptr.vmem [resolvable:$true] %s1423_s6 }
  0x6d   : > { %1985 = vmatpush3.bf16.msra.mxu1 %v1982_v3  ;;  %v1950_v13 = vpack.c.bf16 %v280_v11, %v279_v10  ;;  %v281_v15 = vld [vmem:[#allocation5 + $0x10] sm:$0xff]  ;;  %1902 = vmatprep.mubr.f32.mxu1 %v247_v14  ;;  %v282_v16 = vld [vmem:[#allocation5 + $0x18] sm:$0xff]  ;;  %v283_v18 = vld [vmem:[#allocation5 + $0x20] sm:$0xff]  ;;  %v1994_v20 = vpack.c.bf16 %v527_v12, %v526_v9  ;;  %s2302_s20 = scalar_lea.vmem %s2956_s6, 6144  ;;  %s2306_s5 = sshll.u32 %s2380_s29, 4  ;;  %s2307_s5 = int_to_ptr.vmem [resolvable:$false] %s2306_s5 }
  0x6e   : > { %1987 = vmatprep.subr.bf16.mxu1 %v1986_v5  ;;  %1822 = vmatprep.mubr.f32.mxu0 %v247_v14  ;;  %v1954_v17 = vpack.c.bf16 %v282_v16, %v281_v15  ;;  %v284_v19 = vld [vmem:[#allocation5 + $0x28] sm:$0xff]  ;;  %v528_v21 = vld [vmem:[#allocation7 + $0x40] sm:$0xff]  ;;  %v285_v24 = vld [vmem:[#allocation5 + $0x30] sm:$0xff]  ;;  %p2303_p11 = scmp.ne.s32.totalorder %s2956_s6, %s2302_s20  ;;  %s2308_s9 = scalar_lea.vmem %s2307_s5, 12288 }
  0x6f   : > { %1951 = vmatprep.subr.bf16.mxu0 %v1950_v13  ;;  %v529_v22 = vld [vmem:[#allocation7 + $0x48] sm:$0xff]  ;;  %v1958_v23 = vpack.c.bf16 %v284_v19, %v283_v18  ;;  %v286_v25 = vld [vmem:[#allocation5 + $0x38] sm:$0xff]  ;;  %v530_v27 = vld [vmem:[#allocation7 + $0x50] sm:$0xff]  ;;  %p2309_p7 = scmp.lt.s32.totalorder %s2956_s6, %s2307_s5  ;;  %p2310_p9 = scmp.lt.s32.totalorder %s2308_s9, %s2302_s20 }
  0x70   : > { %1953 = vmatpush3.bf16.msra.mxu0 %v1950_v13  ;;  %v1998_v26 = vpack.c.bf16 %v529_v22, %v528_v21  ;;  %v531_v28 = vld [vmem:[#allocation7 + $0x58] sm:$0xff]  ;;  %v1962_v29 = vpack.c.bf16 %v286_v25, %v285_v24  ;;  %v287_v30 = vld [vmem:[#allocation5 + $0x40] sm:$0xff]  ;;  %v288_v31 = vld [vmem:[#allocation5 + $0x48] sm:$0xff]  ;;  %p2304_p2 = pnand %p2303_p11, %p3020_p0 }
  0x71   : > { %1989 = vmatpush3.bf16.msra.mxu1 %v1986_v5  ;;  %1955 = vmatprep.subr.bf16.mxu0 %v1954_v17  ;;  %v2002_v32 = vpack.c.bf16 %v531_v28, %v530_v27  ;;  %v532_v33 = vld [vmem:[#allocation7 + $0x60] sm:$0xff]  ;;  %v533_v34 = vld [vmem:[#allocation7 + $0x68] sm:$0xff]  ;;  %v1966_v35 = vpack.c.bf16 %v288_v31, %v287_v30  ;;  %v289_v36 = vld [vmem:[#allocation5 + $0x50] sm:$0xff]  ;;  %p2311_p12 = por %p2310_p9, %p2309_p7 }
  0x72   : > { %1991 = vmatprep.subr.bf16.mxu1 %v1990_v8  ;;  %v290_v37 = vld [vmem:[#allocation5 + $0x58] sm:$0xff]  ;;  %v2006_v38 = vpack.c.bf16 %v533_v34, %v532_v33  ;;  %v534_v39 = vld [vmem:[#allocation7 + $0x70] sm:$0xff]  ;;  %v291_v42 = vld [vmem:[#allocation5 + $0x60] sm:$0xff]  ;;  %p2305_p3 = pneg %p2304_p2 }
  0x73   : > { %v535_v40 = vld [vmem:[#allocation7 + $0x78] sm:$0xff]  ;;  %v1970_v41 = vpack.c.bf16 %v290_v37, %v289_v36  ;;  %v292_v43 = vld [vmem:[#allocation5 + $0x68] sm:$0xff]  ;;  %v293_v46 = vld [vmem:[#allocation5 + $0x70] sm:$0xff] }
  0x74   : > { %1957 = vmatpush3.bf16.msra.mxu0 %v1954_v17  ;;  %v2010_v44 = vpack.c.bf16 %v535_v40, %v534_v39  ;;  %v1974_v45 = vpack.c.bf16 %v292_v43, %v291_v42  ;;  %v294_v47 = vld [vmem:[#allocation5 + $0x78] sm:$0xff]  ;;  %v248_v49 = vld [vmem:[%s2593_s28 + $0x8] sm:$0xff]  ;;  %v249_v50 = vld [vmem:[%s2593_s28 + $0x10] sm:$0xff]  ;;  %v2379_v42 = vmov 0.0   ;;  %p2312_p1 = pnand %p2311_p12, %p2305_p3 }
  0x75   : > { %1993 = vmatpush3.bf16.msra.mxu1 %v1990_v8  ;;  %1959 = vmatprep.subr.bf16.mxu0 %v1958_v23  ;;  %v1978_v48 = vpack.c.bf16 %v294_v47, %v293_v46  ;;  %v250_v51 = vld [vmem:[%s2593_s28 + $0x18] sm:$0xff]  ;;  %v251_v52 = vld [vmem:[%s2593_s28 + $0x20] sm:$0xff]  ;;  %v252_v53 = vld [vmem:[%s2593_s28 + $0x28] sm:$0xff] }
  0x76   : > { %1995 = vmatprep.subr.bf16.mxu1 %v1994_v20  ;;  %v253_v54 = vld [vmem:[%s2593_s28 + $0x30] sm:$0xff]  ;;  %v254_v55 = vld [vmem:[%s2593_s28 + $0x38] sm:$0xff]  ;;  %v255_v56 = vld [vmem:[%s2593_s28 + $0x40] sm:$0xff] }
  0x77   : > { %v256_v57 = vld [vmem:[%s2593_s28 + $0x48] sm:$0xff]  ;;  %v257_v58 = vld [vmem:[%s2593_s28 + $0x50] sm:$0xff]  ;;  %v258_v59 = vld [vmem:[%s2593_s28 + $0x58] sm:$0xff] }
  0x78   : > { %1961 = vmatpush3.bf16.msra.mxu0 %v1958_v23  ;;  %v259_v60 = vld [vmem:[%s2593_s28 + $0x60] sm:$0xff]  ;;  %v260_v61 = vld [vmem:[%s2593_s28 + $0x68] sm:$0xff]  ;;  %v261_v62 = vld [vmem:[%s2593_s28 + $0x70] sm:$0xff] }
  0x79   : > { %1997 = vmatpush3.bf16.msra.mxu1 %v1994_v20  ;;  %1963 = vmatprep.subr.bf16.mxu0 %v1962_v29  ;;  %v262_v63 = vld [vmem:[%s2593_s28 + $0x78] sm:$0xff]  ;;  %v263_v0 = vld [vmem:[%s2593_s28 + $0x80] sm:$0xff]  ;;  %v264_v1 = vld [vmem:[%s2593_s28 + $0x88] sm:$0xff] }
  0x7a   : > { %1999 = vmatprep.subr.bf16.mxu1 %v1998_v26  ;;  %v265_v2 = vld [vmem:[%s2593_s28 + $0x90] sm:$0xff]  ;;  %v266_v3 = vld [vmem:[%s2593_s28 + $0x98] sm:$0xff]  ;;  %v267_v4 = vld [vmem:[%s2593_s28 + $0xa0] sm:$0xff] }
  0x7b   : > { %v268_v5 = vld [vmem:[%s2593_s28 + $0xa8] sm:$0xff]  ;;  %v269_v6 = vld [vmem:[%s2593_s28 + $0xb0] sm:$0xff]  ;;  %v270_v7 = vld [vmem:[%s2593_s28 + $0xb8] sm:$0xff] }
  0x7c   : > { %1965 = vmatpush3.bf16.msra.mxu0 %v1962_v29  ;;  %v271_v8 = vld [vmem:[%s2593_s28 + $0xc0] sm:$0xff]  ;;  %v272_v9 = vld [vmem:[%s2593_s28 + $0xc8] sm:$0xff]  ;;  %v273_v10 = vld [vmem:[%s2593_s28 + $0xd0] sm:$0xff] }
  0x7d   : > { %2001 = vmatpush3.bf16.msra.mxu1 %v1998_v26  ;;  %1967 = vmatprep.subr.bf16.mxu0 %v1966_v35  ;;  %v274_v11 = vld [vmem:[%s2593_s28 + $0xd8] sm:$0xff]  ;;  %v275_v12 = vld [vmem:[%s2593_s28 + $0xe0] sm:$0xff]  ;;  %v276_v13 = vld [vmem:[%s2593_s28 + $0xe8] sm:$0xff] }
  0x7e   : > { %2003 = vmatprep.subr.bf16.mxu1 %v2002_v32  ;;  %v277_v14 = vld [vmem:[%s2593_s28 + $0xf0] sm:$0xff]  ;;  %v278_v15 = vld [vmem:[%s2593_s28 + $0xf8] sm:$0xff]  ;;  %v2638_v16 = vld [vmem:[%s3005_s3] ss:$0 sm:$0xff] }
  0x80   : > { %1969 = vmatpush3.bf16.msra.mxu0 %v1966_v35 }
  0x81   : > { %2005 = vmatpush3.bf16.msra.mxu1 %v2002_v32  ;;  %1971 = vmatprep.subr.bf16.mxu0 %v1970_v41 }
  0x82   : > { %2007 = vmatprep.subr.bf16.mxu1 %v2006_v38 }
  0x84   : > { %1973 = vmatpush3.bf16.msra.mxu0 %v1970_v41 }
  0x85   : > { %2009 = vmatpush3.bf16.msra.mxu1 %v2006_v38  ;;  %1975 = vmatprep.subr.bf16.mxu0 %v1974_v45 }
  0x86   : > { %2011 = vmatprep.subr.bf16.mxu1 %v2010_v44 }
  0x88   : > { %1977 = vmatpush3.bf16.msra.mxu0 %v1974_v45 }
  0x89   : > { %2013 = vmatpush3.bf16.msra.mxu1 %v2010_v44  ;;  %1979 = vmatprep.subr.bf16.mxu0 %v1978_v48 }
  0x8c   : > { %1903 = vmatmul.mubr.f32.vlgmr.msra.gmra.mrb[0].mxu1 %v248_v49  ;;  %1981 = vmatpush3.bf16.msra.mxu0 %v1978_v48 }
  0x8d   : > { %1905 = vmatprep.mubr.f32.mxu1 %v249_v50 }
  0x8f   : > { %1823 = vmatmul.mubr.f32.vlgmr.msra.gmra.mrb[0].mxu0 %v248_v49 }
  0x90   : > { %1906 = vmatmul.mubr.f32.gmra.mrb[2].mxu1 %v250_v51  ;;  %1825 = vmatprep.mubr.f32.mxu0 %v249_v50 }
  0x91   : > { %1908 = vmatprep.mubr.f32.mxu1 %v251_v52 }
  0x93   : > { %1826 = vmatmul.mubr.f32.gmra.mrb[2].mxu0 %v250_v51 }
  0x94   : > { %1909 = vmatmul.mubr.f32.gmra.mrb[4].mxu1 %v252_v53  ;;  %1828 = vmatprep.mubr.f32.mxu0 %v251_v52 }
  0x95   : > { %1911 = vmatprep.mubr.f32.mxu1 %v253_v54 }
  0x97   : > { %1829 = vmatmul.mubr.f32.gmra.mrb[4].mxu0 %v252_v53 }
  0x98   : > { %1912 = vmatmul.mubr.f32.gmra.mrb[6].mxu1 %v254_v55  ;;  %1831 = vmatprep.mubr.f32.mxu0 %v253_v54 }
  0x99   : > { %1914 = vmatprep.mubr.f32.mxu1 %v255_v56 }
  0x9b   : > { %1832 = vmatmul.mubr.f32.gmra.mrb[6].mxu0 %v254_v55 }
  0x9c   : > { %1915 = vmatmul.mubr.f32.gmra.mrb[8].mxu1 %v256_v57  ;;  %1834 = vmatprep.mubr.f32.mxu0 %v255_v56 }
  0x9d   : > { %1917 = vmatprep.mubr.f32.mxu1 %v257_v58 }
  0x9f   : > { %1835 = vmatmul.mubr.f32.gmra.mrb[8].mxu0 %v256_v57 }
  0xa0   : > { %1918 = vmatmul.mubr.f32.gmra.mrb[10].mxu1 %v258_v59  ;;  %1837 = vmatprep.mubr.f32.mxu0 %v257_v58 }
  0xa1   : > { %1920 = vmatprep.mubr.f32.mxu1 %v259_v60 }
  0xa3   : > { %1838 = vmatmul.mubr.f32.gmra.mrb[10].mxu0 %v258_v59 }
  0xa4   : > { %1921 = vmatmul.mubr.f32.gmra.mrb[12].mxu1 %v260_v61  ;;  %1840 = vmatprep.mubr.f32.mxu0 %v259_v60 }
  0xa5   : > { %1923 = vmatprep.mubr.f32.mxu1 %v261_v62 }
  0xa7   : > { %1841 = vmatmul.mubr.f32.gmra.mrb[12].mxu0 %v260_v61 }
  0xa8   : > { %1924 = vmatmul.mubr.f32.gmra.mrb[14].mxu1 %v262_v63  ;;  %1843 = vmatprep.mubr.f32.mxu0 %v261_v62 }
  0xa9   : > { %1926 = vmatprep.mubr.f32.mxu1 %v263_v0 }
  0xab   : > { %1844 = vmatmul.mubr.f32.gmra.mrb[14].mxu0 %v262_v63 }
  0xac   : > { %1927 = vmatmul.mubr.f32.gmra.mrb[16].mxu1 %v264_v1  ;;  %1846 = vmatprep.mubr.f32.mxu0 %v263_v0 }
  0xad   : > { %1929 = vmatprep.mubr.f32.mxu1 %v265_v2 }
  0xaf   : > { %1847 = vmatmul.mubr.f32.gmra.mrb[16].mxu0 %v264_v1 }
  0xb0   : > { %1930 = vmatmul.mubr.f32.gmra.mrb[18].mxu1 %v266_v3  ;;  %1849 = vmatprep.mubr.f32.mxu0 %v265_v2 }
  0xb1   : > { %1932 = vmatprep.mubr.f32.mxu1 %v267_v4 }
  0xb3   : > { %1850 = vmatmul.mubr.f32.gmra.mrb[18].mxu0 %v266_v3 }
  0xb4   : > { %1933 = vmatmul.mubr.f32.gmra.mrb[20].mxu1 %v268_v5  ;;  %1852 = vmatprep.mubr.f32.mxu0 %v267_v4 }
  0xb5   : > { %1935 = vmatprep.mubr.f32.mxu1 %v269_v6 }
  0xb7   : > { %1853 = vmatmul.mubr.f32.gmra.mrb[20].mxu0 %v268_v5 }
  0xb8   : > { %1936 = vmatmul.mubr.f32.gmra.mrb[22].mxu1 %v270_v7  ;;  %1855 = vmatprep.mubr.f32.mxu0 %v269_v6 }
  0xb9   : > { %1938 = vmatprep.mubr.f32.mxu1 %v271_v8 }
  0xbb   : > { %1856 = vmatmul.mubr.f32.gmra.mrb[22].mxu0 %v270_v7 }
  0xbc   : > { %1939 = vmatmul.mubr.f32.gmra.mrb[24].mxu1 %v272_v9  ;;  %1858 = vmatprep.mubr.f32.mxu0 %v271_v8 }
  0xbd   : > { %1941 = vmatprep.mubr.f32.mxu1 %v273_v10 }
  0xbf   : > { %1859 = vmatmul.mubr.f32.gmra.mrb[24].mxu0 %v272_v9 }
  0xc0   : > { %1942 = vmatmul.mubr.f32.gmra.mrb[26].mxu1 %v274_v11  ;;  %1861 = vmatprep.mubr.f32.mxu0 %v273_v10 }
  0xc1   : > { %1944 = vmatprep.mubr.f32.mxu1 %v275_v12 }
  0xc3   : > { %1862 = vmatmul.mubr.f32.gmra.mrb[26].mxu0 %v274_v11 }
  0xc4   : > { %1945 = vmatmul.mubr.f32.gmra.mrb[28].mxu1 %v276_v13  ;;  %1864 = vmatprep.mubr.f32.mxu0 %v275_v12 }
  0xc5   : > { %1947 = vmatprep.mubr.f32.mxu1 %v277_v14 }
  0xc7   : > { %1865 = vmatmul.mubr.f32.gmra.mrb[28].mxu0 %v276_v13 }
  0xc8   : > { %1948 = vmatmul.mubr.f32.gmra.mrb[30].mxu1 %v278_v15  ;;  %1867 = vmatprep.mubr.f32.mxu0 %v277_v14 }
  0xcb   : > { %1868 = vmatmul.mubr.f32.gmra.mrb[30].mxu0 %v278_v15 }
 0x15f   : > { %v1904_v17 = vpop.f32.mrb[0].mxu1 }
 0x160   : > { %v615_v18 = vadd.f32 %v1904_v17, %v2638_v16  ;;  %v609_v19 = vpop.f32.mrb[1].mxu1 }
 0x161   : > { %v610_v20 = vadd.f32 %v2638_v16, %v609_v19 }
 0x162   : > { %2088 = vtanh.f32 %v615_v18  ;;  %v2643_v24 = vpop.f32.mrb[0].mxu0 }
 0x163   : > { %2090 = vtanh.f32 %v610_v20  ;;  %v1907_v21 = vpop.f32.mrb[2].mxu1  ;;  %v2646_v26 = vpop.f32.mrb[1].mxu0 }
 0x164   : > { %v625_v22 = vadd.f32 %v1907_v21, %v2638_v16  ;;  %v619_v23 = vpop.f32.mrb[3].mxu1 }
 0x165   : > { %v620_v25 = vadd.f32 %v2638_v16, %v619_v23 }
 0x166   : > { %2092 = vtanh.f32 %v625_v22  ;;  %v2649_v30 = vpop.f32.mrb[2].mxu0 }
 0x167   : > { %2094 = vtanh.f32 %v620_v25  ;;  %v1910_v27 = vpop.f32.mrb[4].mxu1  ;;  %v2652_v32 = vpop.f32.mrb[3].mxu0 }
 0x168   : > { %v635_v28 = vadd.f32 %v1910_v27, %v2638_v16  ;;  %v629_v29 = vpop.f32.mrb[5].mxu1 }
 0x169   : > { %v630_v31 = vadd.f32 %v2638_v16, %v629_v29 }
 0x16a   : > { %2096 = vtanh.f32 %v635_v28  ;;  %v2656_v37 = vpop.f32.mrb[4].mxu0 }
 0x16b   : > { %2098 = vtanh.f32 %v630_v31  ;;  %v1913_v33 = vpop.f32.mrb[6].mxu1  ;;  %v2659_v41 = vpop.f32.mrb[5].mxu0 }
 0x16c   : > { %v2089_v34 = vpop.eup %2088  ;;  %v645_v35 = vadd.f32 %v1913_v33, %v2638_v16  ;;  %v639_v36 = vpop.f32.mrb[7].mxu1 }
 0x16d   : > { %v2091_v38 = vpop.eup %2090  ;;  %vm929_vm0 = vcmp.lt.f32.partialorder %v2089_v34, 0.0  ;;  %v640_v39 = vadd.f32 %v2638_v16, %v639_v36  ;;  %v801_v40 = vand.u32 2147483647, %v2089_v34 }
 0x16e   : > { %v1529_v43 = vsel %vm929_vm0, 1.0, %v2379_v42  ;;  %vm928_vm1 = vcmp.lt.f32.partialorder %v2091_v38, 0.0  ;;  %2100 = vtanh.f32 %v645_v35  ;;  %v800_v44 = vand.u32 2147483647, %v2091_v38  ;;  %v2664_v54 = vpop.f32.mrb[6].mxu0 }
 0x16f   : > { %v1633_v45 = vpack.c.bf16 %v1529_v43, %v1529_v43  ;;  %v1528_v46 = vsel %vm928_vm1, 1.0, %v2379_v42  ;;  %2102 = vtanh.f32 %v640_v39  ;;  %v1916_v47 = vpop.f32.mrb[8].mxu1  ;;  %v833_v48 = vadd.f32 1e-30, %v801_v40  ;;  %v2670_v58 = vpop.f32.mrb[7].mxu0 }
 0x170   : > { %v2093_v49 = vpop.eup %2092  ;;  %v1631_v50 = vpack.c.bf16 %v1528_v46, %v1528_v46  ;;  %v655_v51 = vadd.f32 %v1916_v47, %v2638_v16  ;;  %v649_v52 = vpop.f32.mrb[9].mxu1  ;;  %v832_v53 = vadd.f32 1e-30, %v800_v44 }
 0x171   : > { %v2095_v55 = vpop.eup %2094  ;;  %1347 = vst [vmem:[%s2666_s12 + $0x14] sm:$0xf] %v1633_v45  ;;  %vm931_vm2 = vcmp.lt.f32.partialorder %v2093_v49, 0.0  ;;  %v650_v56 = vadd.f32 %v2638_v16, %v649_v52  ;;  %2104 = vlog2.f32 %v833_v48  ;;  %v803_v57 = vand.u32 2147483647, %v2093_v49 }
 0x172   : > { %1345 = vst [vmem:[%s2666_s12 + $0x8] sm:$0xf] %v1631_v50  ;;  %v1531_v59 = vsel %vm931_vm2, 1.0, %v2379_v42  ;;  %vm930_vm3 = vcmp.lt.f32.partialorder %v2095_v55, 0.0  ;;  %2106 = vtanh.f32 %v655_v51  ;;  %v802_v60 = vand.u32 2147483647, %v2095_v55 }
 0x173   : > { %v1637_v61 = vpack.c.bf16 %v1531_v59, %v1531_v59  ;;  %v1530_v62 = vsel %vm930_vm3, 1.0, %v2379_v42  ;;  %2108 = vtanh.f32 %v650_v56  ;;  %v1919_v63 = vpop.f32.mrb[10].mxu1  ;;  %v835_v0 = vadd.f32 1e-30, %v803_v57  ;;  %v2676_v6 = vpop.f32.mrb[8].mxu0 }
 0x174   : > { %v2097_v1 = vpop.eup %2096  ;;  %v1635_v2 = vpack.c.bf16 %v1530_v62, %v1530_v62  ;;  %v665_v3 = vadd.f32 %v1919_v63, %v2638_v16  ;;  %v659_v4 = vpop.f32.mrb[11].mxu1  ;;  %2110 = vlog2.f32 %v832_v53  ;;  %v834_v5 = vadd.f32 1e-30, %v802_v60 }
 0x175   : > { %v2099_v7 = vpop.eup %2098  ;;  %1351 = vst [vmem:[%s2666_s12 + $0x2c] sm:$0xf] %v1637_v61  ;;  %vm933_vm4 = vcmp.lt.f32.partialorder %v2097_v1, 0.0  ;;  %v660_v8 = vadd.f32 %v2638_v16, %v659_v4  ;;  %2112 = vlog2.f32 %v835_v0  ;;  %v805_v9 = vand.u32 2147483647, %v2097_v1  ;;  %v2680_v10 = vpop.f32.mrb[9].mxu0 }
 0x176   : > { %1349 = vst [vmem:[%s2666_s12 + $0x20] sm:$0xf] %v1635_v2  ;;  %v1533_v11 = vsel %vm933_vm4, 1.0, %v2379_v42  ;;  %vm932_vm5 = vcmp.lt.f32.partialorder %v2099_v7, 0.0  ;;  %2114 = vtanh.f32 %v665_v3  ;;  %v804_v12 = vand.u32 2147483647, %v2099_v7 }
 0x177   : > { %v1641_v13 = vpack.c.bf16 %v1533_v11, %v1533_v11  ;;  %v1532_v14 = vsel %vm932_vm5, 1.0, %v2379_v42  ;;  %2116 = vtanh.f32 %v660_v8  ;;  %v1922_v15 = vpop.f32.mrb[12].mxu1  ;;  %v837_v17 = vadd.f32 1e-30, %v805_v9  ;;  %v2686_v23 = vpop.f32.mrb[10].mxu0 }
 0x178   : > { %v2101_v18 = vpop.eup %2100  ;;  %v1639_v19 = vpack.c.bf16 %v1532_v14, %v1532_v14  ;;  %v675_v20 = vadd.f32 %v1922_v15, %v2638_v16  ;;  %v669_v21 = vpop.f32.mrb[13].mxu1  ;;  %2118 = vlog2.f32 %v834_v5  ;;  %v836_v22 = vadd.f32 1e-30, %v804_v12 }
 0x179   : > { %v2103_v25 = vpop.eup %2102  ;;  %1355 = vst [vmem:[%s2666_s12 + $0x44] sm:$0xf] %v1641_v13  ;;  %vm935_vm6 = vcmp.lt.f32.partialorder %v2101_v18, 0.0  ;;  %v670_v27 = vadd.f32 %v2638_v16, %v669_v21  ;;  %2120 = vlog2.f32 %v837_v17  ;;  %v807_v28 = vand.u32 2147483647, %v2101_v18  ;;  %v2690_v29 = vpop.f32.mrb[11].mxu0 }
 0x17a   : > { %1353 = vst [vmem:[%s2666_s12 + $0x38] sm:$0xf] %v1639_v19  ;;  %v1535_v31 = vsel %vm935_vm6, 1.0, %v2379_v42  ;;  %vm934_vm7 = vcmp.lt.f32.partialorder %v2103_v25, 0.0  ;;  %2122 = vtanh.f32 %v675_v20  ;;  %v806_v33 = vand.u32 2147483647, %v2103_v25 }
 0x17b   : > { %v2105_v34 = vpop.eup %2104  ;;  %v1645_v35 = vpack.c.bf16 %v1535_v31, %v1535_v31  ;;  %v1534_v36 = vsel %vm934_vm7, 1.0, %v2379_v42  ;;  %2124 = vtanh.f32 %v670_v27  ;;  %v1925_v38 = vpop.f32.mrb[14].mxu1  ;;  %v839_v39 = vadd.f32 1e-30, %v807_v28 }
 0x17c   : > { %v2107_v40 = vpop.eup %2106  ;;  %v1643_v43 = vpack.c.bf16 %v1534_v36, %v1534_v36  ;;  %v685_v44 = vadd.f32 %v1925_v38, %v2638_v16  ;;  %v867_v45 = vmul.f32 0.6931472, %v2105_v34  ;;  %v679_v46 = vpop.f32.mrb[15].mxu1  ;;  %2126 = vlog2.f32 %v836_v22 }
 0x17d   : > { %v2696_v47 = vpop.f32.mrb[12].mxu0  ;;  %v2698_v48 = vpop.eup %2108  ;;  %1359 = vst [vmem:[%s2666_s12 + $0x5c] sm:$0xf] %v1645_v35  ;;  %vm937_vm8 = vcmp.lt.f32.partialorder %v2107_v40, 0.0  ;;  %v680_v49 = vadd.f32 %v2638_v16, %v679_v46  ;;  %2128 = vlog2.f32 %v839_v39  ;;  %v838_v50 = vadd.f32 1e-30, %v806_v33 }
 0x17e   : > { %v2702_v51 = vpop.f32.mrb[13].mxu0  ;;  %v2111_v52 = vpop.eup %2110  ;;  %1357 = vst [vmem:[%s2666_s12 + $0x50] sm:$0xf] %v1643_v43  ;;  %v1537_v53 = vsel %vm937_vm8, 1.0, %v2379_v42  ;;  %vm936_vm9 = vcmp.lt.f32.partialorder %v2698_v48, 0.0  ;;  %2130 = vtanh.f32 %v685_v44  ;;  %v1632_v55 = vpack.c.bf16 %v867_v45, %v2643_v24 }
 0x17f   : > { %v2113_v56 = vpop.eup %2112  ;;  %v1649_v57 = vpack.c.bf16 %v1537_v53, %v1537_v53  ;;  %v1536_v59 = vsel %vm936_vm9, 1.0, %v2379_v42  ;;  %2132 = vtanh.f32 %v680_v49  ;;  %v865_v60 = vmul.f32 0.6931472, %v2111_v52  ;;  %v1928_v61 = vpop.f32.mrb[16].mxu1 }
 0x180   : > { %v2709_v62 = vpop.eup %2114  ;;  %v1647_v63 = vpack.c.bf16 %v1536_v59, %v1536_v59  ;;  %1346 = vst [vmem:[%s2666_s12 + $0xc] sm:$0xff] %v1632_v55  ;;  %v695_v0 = vadd.f32 %v1928_v61, %v2638_v16  ;;  %v871_v1 = vmul.f32 0.6931472, %v2113_v56  ;;  %v689_v2 = vpop.f32.mrb[17].mxu1  ;;  %2134 = vlog2.f32 %v838_v50 }
 0x181   : > { %v2713_v3 = vpop.f32.mrb[14].mxu0  ;;  %v2715_v24 = vpop.eup %2116  ;;  %1363 = vst [vmem:[%s2666_s12 + $0x74] sm:$0xf] %v1649_v57  ;;  %vm939_vm10 = vcmp.lt.f32.partialorder %v2709_v62, 0.0  ;;  %v1630_v4 = vpack.c.bf16 %v865_v60, %v2646_v26  ;;  %v690_v5 = vadd.f32 %v2638_v16, %v689_v2  ;;  %v809_v7 = vand.u32 2147483647, %v2107_v40 }
 0x182   : > { %v2721_v8 = vpop.f32.mrb[15].mxu0  ;;  %v2119_v9 = vpop.eup %2118  ;;  %1361 = vst [vmem:[%s2666_s12 + $0x68] sm:$0xf] %v1647_v63  ;;  %v1539_v11 = vsel %vm939_vm10, 1.0, %v2379_v42  ;;  %vm938_vm11 = vcmp.lt.f32.partialorder %v2715_v24, 0.0  ;;  %2136 = vtanh.f32 %v695_v0  ;;  %v1636_v12 = vpack.c.bf16 %v871_v1, %v2649_v30 }
 0x183   : > { %v2121_v13 = vpop.eup %2120  ;;  %v1653_v14 = vpack.c.bf16 %v1539_v11, %v1539_v11  ;;  %v1538_v26 = vsel %vm938_vm11, 1.0, %v2379_v42  ;;  %1344 = vst [vmem:[%s2666_s12] sm:$0xff] %v1630_v4  ;;  %2138 = vtanh.f32 %v690_v5  ;;  %v869_v15 = vmul.f32 0.6931472, %v2119_v9  ;;  %v1931_v17 = vpop.f32.mrb[18].mxu1 }
 0x184   : > { %v2729_v18 = vpop.eup %2122  ;;  %v1651_v19 = vpack.c.bf16 %v1538_v26, %v1538_v26  ;;  %1350 = vst [vmem:[%s2666_s12 + $0x24] sm:$0xff] %v1636_v12  ;;  %v705_v20 = vadd.f32 %v1931_v17, %v2638_v16  ;;  %v875_v21 = vmul.f32 0.6931472, %v2121_v13  ;;  %v699_v22 = vpop.f32.mrb[19].mxu1  ;;  %v841_v25 = vadd.f32 1e-30, %v809_v7 }
 0x185   : > { %v2733_v30 = vpop.f32.mrb[16].mxu0  ;;  %v2735_v27 = vpop.eup %2124  ;;  %1367 = vst [vmem:[%s2666_s12 + $0x8c] sm:$0xf] %v1653_v14  ;;  %vm941_vm12 = vcmp.lt.f32.partialorder %v2729_v18, 0.0  ;;  %v1634_v28 = vpack.c.bf16 %v869_v15, %v2652_v32  ;;  %v700_v31 = vadd.f32 %v2638_v16, %v699_v22  ;;  %v808_v33 = vand.u32 2147483647, %v2698_v48 }
 0x186   : > { %v2742_v34 = vpop.f32.mrb[17].mxu0  ;;  %v2127_v35 = vpop.eup %2126  ;;  %1365 = vst [vmem:[%s2666_s12 + $0x80] sm:$0xf] %v1651_v19  ;;  %v1541_v36 = vsel %vm941_vm12, 1.0, %v2379_v42  ;;  %vm940_vm13 = vcmp.lt.f32.partialorder %v2735_v27, 0.0  ;;  %2140 = vtanh.f32 %v705_v20  ;;  %v1640_v38 = vpack.c.bf16 %v875_v21, %v2656_v37 }
 0x187   : > { %v2129_v39 = vpop.eup %2128  ;;  %v1657_v40 = vpack.c.bf16 %v1541_v36, %v1541_v36  ;;  %v1540_v32 = vsel %vm940_vm13, 1.0, %v2379_v42  ;;  %1348 = vst [vmem:[%s2666_s12 + $0x18] sm:$0xff] %v1634_v28  ;;  %2142 = vtanh.f32 %v700_v31  ;;  %v873_v43 = vmul.f32 0.6931472, %v2127_v35  ;;  %v1934_v44 = vpop.f32.mrb[20].mxu1 }
 0x188   : > { %v2750_v45 = vpop.eup %2130  ;;  %v1655_v46 = vpack.c.bf16 %v1540_v32, %v1540_v32  ;;  %1354 = vst [vmem:[%s2666_s12 + $0x3c] sm:$0xff] %v1640_v38  ;;  %v715_v48 = vadd.f32 %v1934_v44, %v2638_v16  ;;  %v879_v49 = vmul.f32 0.6931472, %v2129_v39  ;;  %v709_v50 = vpop.f32.mrb[21].mxu1  ;;  %2144 = vlog2.f32 %v841_v25 }
 0x189   : > { %v2754_v37 = vpop.f32.mrb[18].mxu0  ;;  %v2756_v52 = vpop.eup %2132  ;;  %1371 = vst [vmem:[%s2666_s12 + $0xa4] sm:$0xf] %v1657_v40  ;;  %vm943_vm14 = vcmp.lt.f32.partialorder %v2750_v45, 0.0  ;;  %v1638_v53 = vpack.c.bf16 %v873_v43, %v2659_v41  ;;  %v710_v55 = vadd.f32 %v2638_v16, %v709_v50  ;;  %v840_v56 = vadd.f32 1e-30, %v808_v33 }
 0x18a   : > { %v2762_v57 = vpop.f32.mrb[19].mxu0  ;;  %v2135_v59 = vpop.eup %2134  ;;  %1369 = vst [vmem:[%s2666_s12 + $0x98] sm:$0xf] %v1655_v46  ;;  %v1543_v60 = vsel %vm943_vm14, 1.0, %v2379_v42  ;;  %vm942_vm15 = vcmp.lt.f32.partialorder %v2756_v52, 0.0  ;;  %2146 = vtanh.f32 %v715_v48  ;;  %v1644_v61 = vpack.c.bf16 %v879_v49, %v2664_v54 }
 0x18b   : > { %v1661_v63 = vpack.c.bf16 %v1543_v60, %v1543_v60  ;;  %v1542_v0 = vsel %vm942_vm15, 1.0, %v2379_v42  ;;  %1352 = vst [vmem:[%s2666_s12 + $0x30] sm:$0xff] %v1638_v53  ;;  %2148 = vtanh.f32 %v710_v55  ;;  %v877_v41 = vmul.f32 0.6931472, %v2135_v59  ;;  %v1937_v1 = vpop.f32.mrb[22].mxu1  ;;  %v2775_v54 = vpop.f32.mrb[20].mxu0 }
 0x18c   : > { %v2770_v2 = vpop.eup %2136  ;;  %v1659_v4 = vpack.c.bf16 %v1542_v0, %v1542_v0  ;;  %1358 = vst [vmem:[%s2666_s12 + $0x54] sm:$0xff] %v1644_v61  ;;  %v725_v5 = vadd.f32 %v1937_v1, %v2638_v16  ;;  %v719_v7 = vpop.f32.mrb[23].mxu1  ;;  %2150 = vlog2.f32 %v840_v56  ;;  %v811_v9 = vand.u32 2147483647, %v2709_v62 }
 0x18d   : > { %v2777_v11 = vpop.eup %2138  ;;  %1375 = vst [vmem:[%s2666_s12 + $0xbc] sm:$0xf] %v1661_v63  ;;  %vm945_vm0 = vcmp.lt.f32.partialorder %v2770_v2, 0.0  ;;  %v1642_v12 = vpack.c.bf16 %v877_v41, %v2670_v58  ;;  %v720_v13 = vadd.f32 %v2638_v16, %v719_v7  ;;  %v810_v14 = vand.u32 2147483647, %v2715_v24  ;;  %v2784_v26 = vpop.f32.mrb[21].mxu0 }
 0x18e   : > { %1373 = vst [vmem:[%s2666_s12 + $0xb0] sm:$0xf] %v1659_v4  ;;  %v1545_v15 = vsel %vm945_vm0, 1.0, %v2379_v42  ;;  %vm944_vm1 = vcmp.lt.f32.partialorder %v2777_v11, 0.0  ;;  %2152 = vtanh.f32 %v725_v5  ;;  %v843_v62 = vadd.f32 1e-30, %v811_v9 }
 0x18f   : > { %v1665_v17 = vpack.c.bf16 %v1545_v15, %v1545_v15  ;;  %v1544_v19 = vsel %vm944_vm1, 1.0, %v2379_v42  ;;  %1356 = vst [vmem:[%s2666_s12 + $0x48] sm:$0xff] %v1642_v12  ;;  %2154 = vtanh.f32 %v720_v13  ;;  %v1940_v58 = vpop.f32.mrb[24].mxu1  ;;  %v842_v20 = vadd.f32 1e-30, %v810_v14  ;;  %v2795_v31 = vpop.f32.mrb[22].mxu0 }
 0x190   : > { %v2791_v21 = vpop.eup %2140  ;;  %v1663_v24 = vpack.c.bf16 %v1544_v19, %v1544_v19  ;;  %v735_v22 = vadd.f32 %v1940_v58, %v2638_v16  ;;  %2156 = vlog2.f32 %v843_v62  ;;  %v729_v25 = vpop.f32.mrb[25].mxu1  ;;  %v813_v28 = vand.u32 2147483647, %v2729_v18 }
 0x191   : > { %v2797_v33 = vpop.eup %2142  ;;  %1379 = vst [vmem:[%s2666_s12 + $0xd4] sm:$0xf] %v1665_v17  ;;  %vm947_vm2 = vcmp.lt.f32.partialorder %v2791_v21, 0.0  ;;  %v730_v35 = vadd.f32 %v2638_v16, %v729_v25  ;;  %2158 = vlog2.f32 %v842_v20  ;;  %v812_v36 = vand.u32 2147483647, %v2735_v27  ;;  %v2803_v38 = vpop.f32.mrb[23].mxu0 }
 0x192   : > { %v2145_v39 = vpop.eup %2144  ;;  %1377 = vst [vmem:[%s2666_s12 + $0xc8] sm:$0xf] %v1663_v24  ;;  %v1547_v40 = vsel %vm947_vm2, 1.0, %v2379_v42  ;;  %vm946_vm3 = vcmp.lt.f32.partialorder %v2797_v33, 0.0  ;;  %2160 = vtanh.f32 %v735_v22  ;;  %v845_v18 = vadd.f32 1e-30, %v813_v28 }
 0x193   : > { %v1669_v32 = vpack.c.bf16 %v1547_v40, %v1547_v40  ;;  %v1546_v43 = vsel %vm946_vm3, 1.0, %v2379_v42  ;;  %v883_v44 = vmul.f32 0.6931472, %v2145_v39  ;;  %2162 = vtanh.f32 %v730_v35  ;;  %v1943_v46 = vpop.f32.mrb[26].mxu1  ;;  %v2812_v55 = vpop.f32.mrb[24].mxu0 }
 0x194   : > { %v2809_v48 = vpop.eup %2146  ;;  %v1667_v27 = vpack.c.bf16 %v1546_v43, %v1546_v43  ;;  %v745_v49 = vadd.f32 %v1943_v46, %v2638_v16  ;;  %2164 = vlog2.f32 %v845_v18  ;;  %v739_v50 = vpop.f32.mrb[27].mxu1  ;;  %v844_v53 = vadd.f32 1e-30, %v812_v36 }
 0x195   : > { %v2814_v56 = vpop.eup %2148  ;;  %1383 = vst [vmem:[%s2666_s12 + $0xec] sm:$0xf] %v1669_v32  ;;  %vm949_vm4 = vcmp.lt.f32.partialorder %v2809_v48, 0.0  ;;  %v1648_v59 = vpack.c.bf16 %v883_v44, %v2676_v6  ;;  %v740_v60 = vadd.f32 %v2638_v16, %v739_v50  ;;  %v815_v61 = vand.u32 2147483647, %v2750_v45  ;;  %v2821_v63 = vpop.f32.mrb[25].mxu0 }
 0x196   : > { %v2151_v0 = vpop.eup %2150  ;;  %1381 = vst [vmem:[%s2666_s12 + $0xe0] sm:$0xf] %v1667_v27  ;;  %v1549_v41 = vsel %vm949_vm4, 1.0, %v2379_v42  ;;  %vm948_vm5 = vcmp.lt.f32.partialorder %v2814_v56, 0.0  ;;  %2166 = vtanh.f32 %v745_v49  ;;  %v814_v1 = vand.u32 2147483647, %v2756_v52 }
 0x197   : > { %v1673_v4 = vpack.c.bf16 %v1549_v41, %v1549_v41  ;;  %v1548_v5 = vsel %vm948_vm5, 1.0, %v2379_v42  ;;  %1362 = vst [vmem:[%s2666_s12 + $0x6c] sm:$0xff] %v1648_v59  ;;  %v881_v6 = vmul.f32 0.6931472, %v2151_v0  ;;  %2168 = vtanh.f32 %v740_v60  ;;  %v1946_v7 = vpop.f32.mrb[28].mxu1  ;;  %v2832_v15 = vpop.f32.mrb[26].mxu0 }
 0x198   : > { %v2829_v45 = vpop.eup %2152  ;;  %v1671_v9 = vpack.c.bf16 %v1548_v5, %v1548_v5  ;;  %2170 = vlog2.f32 %v844_v53  ;;  %v755_v12 = vadd.f32 %v1946_v7, %v2638_v16  ;;  %v847_v13 = vadd.f32 1e-30, %v815_v61  ;;  %v749_v14 = vpop.f32.mrb[29].mxu1 }
 0x199   : > { %v2834_v62 = vpop.eup %2154  ;;  %1387 = vst [vmem:[%s2666_s12 + $0x104] sm:$0xf] %v1673_v4  ;;  %vm951_vm6 = vcmp.lt.f32.partialorder %v2829_v45, 0.0  ;;  %v1646_v52 = vpack.c.bf16 %v881_v6, %v2680_v10  ;;  %v750_v17 = vadd.f32 %v2638_v16, %v749_v14  ;;  %v846_v19 = vadd.f32 1e-30, %v814_v1  ;;  %v2840_v58 = vpop.f32.mrb[27].mxu0 }
 0x19a   : > { %v2157_v20 = vpop.eup %2156  ;;  %1385 = vst [vmem:[%s2666_s12 + $0xf8] sm:$0xf] %v1671_v9  ;;  %v1551_v24 = vsel %vm951_vm6, 1.0, %v2379_v42  ;;  %vm950_vm7 = vcmp.lt.f32.partialorder %v2834_v62, 0.0  ;;  %2172 = vtanh.f32 %v755_v12  ;;  %v817_v22 = vand.u32 2147483647, %v2770_v2 }
 0x19b   : > { %v2159_v25 = vpop.eup %2158  ;;  %v1677_v28 = vpack.c.bf16 %v1551_v24, %v1551_v24  ;;  %v1550_v35 = vsel %vm950_vm7, 1.0, %v2379_v42  ;;  %1360 = vst [vmem:[%s2666_s12 + $0x60] sm:$0xff] %v1646_v52  ;;  %v887_v10 = vmul.f32 0.6931472, %v2157_v20  ;;  %2174 = vlog2.f32 %v847_v13  ;;  %v1949_v36 = vpop.f32.mrb[30].mxu1 }
 0x19c   : > { %v2848_v39 = vpop.eup %2160  ;;  %v1675_v40 = vpack.c.bf16 %v1550_v35, %v1550_v35  ;;  %v885_v18 = vmul.f32 0.6931472, %v2159_v25  ;;  %2176 = vtanh.f32 %v750_v17  ;;  %v765_v32 = vadd.f32 %v1949_v36, %v2638_v16  ;;  %v759_v43 = vpop.f32.mrb[31].mxu1 }
 0x19d   : > { %v2851_v2 = vpop.f32.mrb[28].mxu0  ;;  %v2853_v44 = vpop.eup %2162  ;;  %1391 = vst [vmem:[%s2666_s12 + $0x11c] sm:$0xf] %v1677_v28  ;;  %vm953_vm8 = vcmp.lt.f32.partialorder %v2848_v39, 0.0  ;;  %v1652_v46 = vpack.c.bf16 %v887_v10, %v2686_v23  ;;  %2178 = vlog2.f32 %v846_v19  ;;  %v849_v27 = vadd.f32 1e-30, %v817_v22 }
 0x19e   : > { %v2858_v49 = vpop.f32.mrb[29].mxu0  ;;  %v2165_v50 = vpop.eup %2164  ;;  %1389 = vst [vmem:[%s2666_s12 + $0x110] sm:$0xf] %v1675_v40  ;;  %v1553_v53 = vsel %vm953_vm8, 1.0, %v2379_v42  ;;  %vm952_vm9 = vcmp.lt.f32.partialorder %v2853_v44, 0.0  ;;  %v1650_v59 = vpack.c.bf16 %v885_v18, %v2690_v29  ;;  %2180 = vtanh.f32 %v765_v32 }
 0x19f   : > { %v1681_v60 = vpack.c.bf16 %v1553_v53, %v1553_v53  ;;  %1366 = vst [vmem:[%s2666_s12 + $0x84] sm:$0xff] %v1652_v46  ;;  %v1552_v61 = vsel %vm952_vm9, 1.0, %v2379_v42  ;;  %v891_v23 = vmul.f32 0.6931472, %v2165_v50  ;;  %2182 = vlog2.f32 %v849_v27  ;;  %v2872_v29 = vpop.f32.mrb[30].mxu0 }
 0x1a0   : > { %v2866_v0 = vpop.eup %2166  ;;  %v1679_v41 = vpack.c.bf16 %v1552_v61, %v1552_v61  ;;  %1364 = vst [vmem:[%s2666_s12 + $0x78] sm:$0xff] %v1650_v59  ;;  %v760_v1 = vadd.f32 %v2638_v16, %v759_v43  ;;  %v816_v4 = vand.u32 2147483647, %v2777_v11  ;;  %v819_v5 = vand.u32 2147483647, %v2791_v21  ;;  %v2881_v13 = vpop.f32.mrb[31].mxu0 }
 0x1a1   : > { %v2874_v6 = vpop.eup %2168  ;;  %1395 = vst [vmem:[%s2666_s12 + $0x134] sm:$0xf] %v1681_v60  ;;  %vm955_vm10 = vcmp.lt.f32.partialorder %v2866_v0, 0.0  ;;  %v1656_v7 = vpack.c.bf16 %v891_v23, %v2696_v47  ;;  %v818_v9 = vand.u32 2147483647, %v2797_v33 }
 0x1a2   : > { %v821_v12 = vand.u32 2147483647, %v2809_v48  ;;  %v2171_v16 = vpop.eup %2170  ;;  %1393 = vst [vmem:[%s2666_s12 + $0x128] sm:$0xf] %v1679_v41  ;;  %v1555_v11 = vsel %vm955_vm10, 1.0, %v2379_v42  ;;  %vm954_vm11 = vcmp.lt.f32.partialorder %v2874_v6, 0.0  ;;  %2184 = vtanh.f32 %v760_v1 }
 0x1a3   : > { %v848_v21 = vadd.f32 1e-30, %v816_v4  ;;  %v1685_v14 = vpack.c.bf16 %v1555_v11, %v1555_v11  ;;  %1370 = vst [vmem:[%s2666_s12 + $0x9c] sm:$0xff] %v1656_v7  ;;  %v1554_v47 = vsel %vm954_vm11, 1.0, %v2379_v42  ;;  %v889_v52 = vmul.f32 0.6931472, %v2171_v16 }
 0x1a4   : > { %v851_v33 = vadd.f32 1e-30, %v819_v5  ;;  %v2888_v17 = vpop.eup %2172  ;;  %v1683_v48 = vpack.c.bf16 %v1554_v47, %v1554_v47  ;;  %v850_v19 = vadd.f32 1e-30, %v818_v9  ;;  %v853_v20 = vadd.f32 1e-30, %v821_v12 }
 0x1a5   : > { %2186 = vlog2.f32 %v848_v21  ;;  %v2175_v24 = vpop.eup %2174  ;;  %1399 = vst [vmem:[%s2666_s12 + $0x14c] sm:$0xf] %v1685_v14  ;;  %v1654_v22 = vpack.c.bf16 %v889_v52, %v2702_v51  ;;  %vm957_vm12 = vcmp.lt.f32.partialorder %v2888_v17, 0.0  ;;  %v820_v25 = vand.u32 2147483647, %v2814_v56 }
 0x1a6   : > { %2188 = vlog2.f32 %v851_v33  ;;  %v2894_v28 = vpop.eup %2176  ;;  %1397 = vst [vmem:[%s2666_s12 + $0x140] sm:$0xf] %v1683_v48  ;;  %v1557_v35 = vsel %vm957_vm12, 1.0, %v2379_v42  ;;  %v895_v10 = vmul.f32 0.6931472, %v2175_v24 }
 0x1a7   : > { %2190 = vlog2.f32 %v850_v19  ;;  %v823_v36 = vand.u32 2147483647, %v2829_v45  ;;  %v2179_v40 = vpop.eup %2178  ;;  %1368 = vst [vmem:[%s2666_s12 + $0x90] sm:$0xff] %v1654_v22  ;;  %v1689_v18 = vpack.c.bf16 %v1557_v35, %v1557_v35  ;;  %vm956_vm13 = vcmp.lt.f32.partialorder %v2894_v28, 0.0 }
 0x1a8   : > { %2192 = vlog2.f32 %v853_v20  ;;  %v852_v51 = vadd.f32 1e-30, %v820_v25  ;;  %v2181_v32 = vpop.eup %2180  ;;  %v1660_v56 = vpack.c.bf16 %v895_v10, %v2713_v3  ;;  %v1556_v43 = vsel %vm956_vm13, 1.0, %v2379_v42 }
 0x1a9   : > { %v893_v46 = vmul.f32 0.6931472, %v2179_v40  ;;  %v855_v27 = vadd.f32 1e-30, %v823_v36  ;;  %v2183_v50 = vpop.eup %2182  ;;  %1403 = vst [vmem:[%s2666_s12 + $0x164] sm:$0xf] %v1689_v18  ;;  %v1687_v45 = vpack.c.bf16 %v1556_v43, %v1556_v43 }
 0x1aa   : > { %vm959_vm14 = vcmp.lt.f32.partialorder %v2181_v32, 0.0  ;;  %2194 = vlog2.f32 %v852_v51  ;;  %v822_v53 = vand.u32 2147483647, %v2834_v62  ;;  %1374 = vst [vmem:[%s2666_s12 + $0xb4] sm:$0xff] %v1660_v56  ;;  %v899_v61 = vmul.f32 0.6931472, %v2183_v50 }
 0x1ab   : > { %v1658_v59 = vpack.c.bf16 %v893_v46, %v2721_v8  ;;  %v1559_v60 = vsel %vm959_vm14, 1.0, %v2379_v42  ;;  %2196 = vlog2.f32 %v855_v27  ;;  %1401 = vst [vmem:[%s2666_s12 + $0x158] sm:$0xf] %v1687_v45  ;;  %v825_v41 = vand.u32 2147483647, %v2848_v39 }
 0x1ac   : > { %v1693_v3 = vpack.c.bf16 %v1559_v60, %v1559_v60  ;;  %v854_v23 = vadd.f32 1e-30, %v822_v53  ;;  %v824_v1 = vand.u32 2147483647, %v2853_v44  ;;  %v2185_v4 = vpop.eup %2184  ;;  %v1664_v62 = vpack.c.bf16 %v899_v61, %v2733_v30 }
 0x1ad   : > { %1372 = vst [vmem:[%s2666_s12 + $0xa8] sm:$0xff] %v1658_v59  ;;  %v827_v5 = vand.u32 2147483647, %v2866_v0  ;;  %v826_v8 = vand.u32 2147483647, %v2874_v6  ;;  %vm958_vm15 = vcmp.lt.f32.partialorder %v2185_v4, 0.0 }
 0x1ae   : > { %v829_v7 = vand.u32 2147483647, %v2888_v17  ;;  %1407 = vst [vmem:[%s2666_s12 + $0x17c] sm:$0xf] %v1693_v3  ;;  %2198 = vlog2.f32 %v854_v23  ;;  %v857_v9 = vadd.f32 1e-30, %v825_v41 }
 0x1af   : > { %v856_v12 = vadd.f32 1e-30, %v824_v1  ;;  %v2187_v16 = vpop.eup %2186  ;;  %1378 = vst [vmem:[%s2666_s12 + $0xcc] sm:$0xff] %v1664_v62  ;;  %v1558_v39 = vsel %vm958_vm15, 1.0, %v2379_v42  ;;  %v859_v44 = vadd.f32 1e-30, %v827_v5 }
 0x1b0   : > { %v858_v11 = vadd.f32 1e-30, %v826_v8  ;;  %v2189_v21 = vpop.eup %2188  ;;  %v1691_v30 = vpack.c.bf16 %v1558_v39, %v1558_v39  ;;  %v897_v14 = vmul.f32 0.6931472, %v2187_v16  ;;  %2200 = vlog2.f32 %v857_v9 }
 0x1b1   : > { %v861_v0 = vadd.f32 1e-30, %v829_v7  ;;  %v2191_v6 = vpop.eup %2190  ;;  %v903_v47 = vmul.f32 0.6931472, %v2189_v21  ;;  %2202 = vlog2.f32 %v856_v12  ;;  %v828_v52 = vand.u32 2147483647, %v2894_v28 }
 0x1b2   : > { %v831_v33 = vand.u32 2147483647, %v2181_v32  ;;  %v2193_v17 = vpop.eup %2192  ;;  %1405 = vst [vmem:[%s2666_s12 + $0x170] sm:$0xf] %v1691_v30  ;;  %v1662_v48 = vpack.c.bf16 %v897_v14, %v2742_v34  ;;  %v901_v42 = vmul.f32 0.6931472, %v2191_v6  ;;  %2204 = vlog2.f32 %v859_v44 }
 0x1b3   : > { %v830_v19 = vand.u32 2147483647, %v2185_v4  ;;  %v1668_v20 = vpack.c.bf16 %v903_v47, %v2754_v37  ;;  %v907_v24 = vmul.f32 0.6931472, %v2193_v17  ;;  %2206 = vlog2.f32 %v858_v11 }
 0x1b4   : > { %v860_v22 = vadd.f32 1e-30, %v828_v52  ;;  %v2195_v25 = vpop.eup %2194  ;;  %1376 = vst [vmem:[%s2666_s12 + $0xc0] sm:$0xff] %v1662_v48  ;;  %v1666_v28 = vpack.c.bf16 %v901_v42, %v2762_v57  ;;  %2208 = vlog2.f32 %v861_v0  ;;  %v863_v35 = vadd.f32 1e-30, %v831_v33 }
 0x1b5   : > { %v862_v10 = vadd.f32 1e-30, %v830_v19  ;;  %v2197_v36 = vpop.eup %2196  ;;  %1382 = vst [vmem:[%s2666_s12 + $0xe4] sm:$0xff] %v1668_v20  ;;  %v1672_v34 = vpack.c.bf16 %v907_v24, %v2775_v54  ;;  %v905_v40 = vmul.f32 0.6931472, %v2195_v25 }
 0x1b6   : > { %2210 = vlog2.f32 %v860_v22  ;;  %1380 = vst [vmem:[%s2666_s12 + $0xd8] sm:$0xff] %v1666_v28  ;;  %v911_v37 = vmul.f32 0.6931472, %v2197_v36 }
 0x1b7   : > { %2212 = vlog2.f32 %v863_v35  ;;  %1386 = vst [vmem:[%s2666_s12 + $0xfc] sm:$0xff] %v1672_v34  ;;  %v1670_v18 = vpack.c.bf16 %v905_v40, %v2784_v26 }
 0x1b8   : > { %2214 = vlog2.f32 %v862_v10  ;;  %v2199_v57 = vpop.eup %2198  ;;  %v1676_v51 = vpack.c.bf16 %v911_v37, %v2795_v31 }
 0x1b9   : > { %1384 = vst [vmem:[%s2666_s12 + $0xf0] sm:$0xff] %v1670_v18  ;;  %v909_v32 = vmul.f32 0.6931472, %v2199_v57 }
 0x1ba   : > { %v2201_v56 = vpop.eup %2200  ;;  %1390 = vst [vmem:[%s2666_s12 + $0x114] sm:$0xff] %v1676_v51 }
 0x1bb   : > { %v2203_v43 = vpop.eup %2202  ;;  %v1674_v54 = vpack.c.bf16 %v909_v32, %v2803_v38  ;;  %v915_v46 = vmul.f32 0.6931472, %v2201_v56 }
 0x1bc   : > { %v2205_v27 = vpop.eup %2204  ;;  %v913_v50 = vmul.f32 0.6931472, %v2203_v43 }
 0x1bd   : > { %v2207_v45 = vpop.eup %2206  ;;  %1388 = vst [vmem:[%s2666_s12 + $0x108] sm:$0xff] %v1674_v54  ;;  %v1680_v26 = vpack.c.bf16 %v915_v46, %v2812_v55  ;;  %v919_v53 = vmul.f32 0.6931472, %v2205_v27 }
 0x1be   : > { %v2209_v31 = vpop.eup %2208  ;;  %v1678_v59 = vpack.c.bf16 %v913_v50, %v2821_v63  ;;  %v917_v60 = vmul.f32 0.6931472, %v2207_v45 }
 0x1bf   : > { %1394 = vst [vmem:[%s2666_s12 + $0x12c] sm:$0xff] %v1680_v26  ;;  %v1684_v38 = vpack.c.bf16 %v919_v53, %v2832_v15  ;;  %v923_v3 = vmul.f32 0.6931472, %v2209_v31 }
 0x1c0   : > { %v2211_v61 = vpop.eup %2210  ;;  %1392 = vst [vmem:[%s2666_s12 + $0x120] sm:$0xff] %v1678_v59  ;;  %v1682_v41 = vpack.c.bf16 %v917_v60, %v2840_v58 }
 0x1c1   : > { %v2213_v23 = vpop.eup %2212  ;;  %v921_v55 = vmul.f32 0.6931472, %v2211_v61  ;;  %1398 = vst [vmem:[%s2666_s12 + $0x144] sm:$0xff] %v1684_v38  ;;  %v1688_v63 = vpack.c.bf16 %v923_v3, %v2851_v2 }
 0x1c2   : > { %v2215_v1 = vpop.eup %2214  ;;  %v927_v4 = vmul.f32 0.6931472, %v2213_v23  ;;  %1396 = vst [vmem:[%s2666_s12 + $0x138] sm:$0xff] %v1682_v41 }
 0x1c3   : > { %v1686_v15 = vpack.c.bf16 %v921_v55, %v2858_v49  ;;  %v925_v62 = vmul.f32 0.6931472, %v2215_v1  ;;  %1402 = vst [vmem:[%s2666_s12 + $0x15c] sm:$0xff] %v1688_v63 }
 0x1c4   : > { %v1692_v5 = vpack.c.bf16 %v927_v4, %v2872_v29 }
 0x1c5   : > { %1400 = vst [vmem:[%s2666_s12 + $0x150] sm:$0xff] %v1686_v15  ;;  %v1690_v58 = vpack.c.bf16 %v925_v62, %v2881_v13 }
 0x1c6   : > { %1406 = vst [vmem:[%s2666_s12 + $0x174] sm:$0xff] %v1692_v5 }
 0x1c7   : > { %1404 = vst [vmem:[%s2666_s12 + $0x168] sm:$0xff] %v1690_v58 }
 0x1c8   : > { %2315 = shalt.err (!%p2312_p1)
}
 0x1c9   : > { %s2316_s10 = scalar_lea.hbm %s2952_s7, 6144  ;;  %s2320_s21 = scalar_lea.hbm %s3006_s4, 12288 }
 0x1ca   : > { %p2317_p13 = scmp.ne.s32.totalorder %s2952_s7, %s2316_s10  ;;  %p2321_p4 = scmp.lt.u32.totalorder %s2952_s7, %s3006_s4 }
 0x1cb   : > { %p2322_p5 = scmp.lt.u32.totalorder %s2320_s21, %s2316_s10  ;;  %p2324_p11 = scmp.lt.u32.totalorder %s2316_s10, %s2952_s7 }
 0x1cc   : > { %p2318_p6 = pnand %p2317_p13, %p3020_p0 }
 0x1cd   : > { %p2323_p8 = por %p2322_p5, %p2321_p4 }
 0x1ce   : > { %p2319_p10 = pneg %p2318_p6 }
 0x1cf   : > { %p2325_p2 = por %p2324_p11, %p2323_p8 }
 0x1d1   : > { %p2326_p3 = pnand %p2325_p2, %p2319_p10 }
 0x1d3   : > { %2329 = shalt.err (!%p2326_p3)
}
 0x1d4   : > { %s2381_s12 = smov 192   ;;  %s2382_s30 = smov 12  }
 0x1d5   : > { %2026 = dma.vmem_to_hbm [thread:$0]  (%p3020_p0), %s2956_s6, 6144, %s2952_s7, %s1409_s27, %s2381_s12, %s2381_s12, %s2382_s30  }
 0x1d6 PF: > { %s1438_s19 = sand.u32 1, %s2360_s15   ;;  %p3021_p7 = scmp.ne.s32.totalorder %s3011_s22, 0 }
 0x1d7   : > { %p3022_p9 = scmp.ge.s32.totalorder %s2372_s18, 2  ;;  %s1439_s25 = scalar_lea.sflag [#allocation4], %s1438_s19 }
 0x1d9   : > { %p2040_p12 = pnand %p3022_p9, %p3021_p7 }
 0x1db   : > { %2355 = dma.done.wait (!%p2040_p12), %s1439_s25, 6144  }
 0x1dc   : > { %2357 = vsyncadd (!%p2040_p12), %s1439_s25, 4294961152  ;;  %p18_p1 = scmp.ge.s32.totalorder %s2524_s26, 4   ;;  %s3023_s15 = smov %s2364_s16 }
 0x1dd   : > { %s3024_s16 = smov %s2368_s17  ;;  %s3025_s17 = smov %s2540_s14 }
 0x1de   : > { %s3026_s18 = smov %s2524_s26  ;;  %20 = sbr.rel (!%p18_p1) target bundleno = 6 (0x6), region = 89 }
 0x1e5   :  { %1444 = vsyncpa [#allocation3], 1 }
 0x1e6   :  { %1446 = vsyncpa [#allocation3 + $0x1], 1 }
 0x1e7   :  { %1447 = vsyncpa [#allocation6], 1 }
 0x1e8   :  { %1448 = vsyncpa [#allocation4], 1 }
 0x1e9   :  { %1450 = vsyncpa [#allocation4 + $0x1], 1 }

</bundles_post_ra>
